<compile_context>
chip_gen: v5e
topology: v5e:2x2
jax: 0.10.0
libtpu: 0.0.40
codegen_flags: <defaults>
</compile_context>

<pallas_src>
import functools

import numpy as np

import jax
import jax.numpy as jnp
from jax.experimental import pallas as pl
from jax.experimental.pallas import tpu as pltpu


# ----------------------------------------------------------------------------
# pltpu.roll convention probe (shift direction), detected once on real HW.
# ----------------------------------------------------------------------------
_ROLL_IS_JNP_CONVENTION = True   # result[i] = x[(i - shift) % n], like jnp.roll


def _detect_roll_convention():
    def k(x_ref, o_ref):
        o_ref[...] = pltpu.roll(x_ref[...], shift=1, axis=0)

    x = jnp.arange(8 * 128, dtype=jnp.float32).reshape(8, 128)
    y = pl.pallas_call(k, out_shape=jax.ShapeDtypeStruct((8, 128), jnp.float32))(x)
    return float(y[1, 0]) == float(x[0, 0])


def _shift_rows_up(v, k):
    """Rows shifted so row i holds original row (i + k) % rows (k static >= 0)."""
    if k == 0:
        return v
    n = v.shape[0]
    shift = (n - k) % n if _ROLL_IS_JNP_CONVENTION else k
    return pltpu.roll(v, shift=shift, axis=0)


# ----------------------------------------------------------------------------
# The single fused kernel
# ----------------------------------------------------------------------------
def _lenet5_kernel(x_ref,                       # (B*28, 28) input rows = (b, y)
                   c1_ref, b1c_ref,             # conv1 Toeplitz (140,144) + bias
                   c2_ref, b2c_ref,             # conv2 Toeplitz (360,128) + bias
                   sf_ref,                      # flatten row gather (4, B, B*28)
                   w1_ref, b1_ref,              # fc1 (256,128) + bias
                   w2_ref, b2_ref,              # fc2 (128,128) + bias
                   w3_ref, b3_ref,              # fc3 (128,128) + bias
                   o_ref):                      # (B, 128) lane-dense logits
    bf16 = jnp.bfloat16
    dot = functools.partial(jnp.dot, preferred_element_type=jnp.float32)
    up = _shift_rows_up

    x = x_ref[...]                                                   # (B*28, 28) f32

    # conv1 + bias + ReLU: one matmul, K stacked over the 5 kernel rows.
    # Output lanes: p*72 + xo*6 + co with output column x = 2*xo + p.
    xs = jnp.concatenate([x] + [up(x, dy) for dy in range(1, 5)], axis=1)   # (B*28,140)
    h1 = dot(xs.astype(bf16), c1_ref[...]) + b1c_ref[...]            # (B*28, 144)
    h1 = jnp.maximum(h1, 0.0)

    # 2x2 max-pool #1: even/odd x columns live in the two lane halves -> max;
    # row pair via roll+max (28->24 row compaction is folded into `sf` later).
    pw1 = jnp.maximum(h1[:, :72], h1[:, 72:])                        # (B*28, 72)
    p1 = jnp.maximum(pw1, up(pw1, 1))                                # valid rows 2*yo

    # conv2 + bias + ReLU: one matmul, K stacked over 5 kernel rows (stride-2
    # row shifts because pooled rows sit at even offsets).
    ps = jnp.concatenate([p1] + [up(p1, 2 * dy) for dy in range(1, 5)], axis=1)
    h2 = dot(ps.astype(bf16), c2_ref[...]) + b2c_ref[...]            # (B*28, 128)
    h2 = jnp.maximum(h2, 0.0)

    # 2x2 max-pool #2 (same trick).
    pw2 = jnp.maximum(h2[:, :64], h2[:, 64:])                        # (B*28, 64)
    p2 = jnp.maximum(pw2, up(pw2, 2)).astype(bf16)                   # valid rows 4*t

    # Flatten: gather the 4 valid rows of each image, pack along lanes.
    f = jnp.concatenate([dot(sf_ref[t], p2).astype(bf16) for t in range(4)],
                        axis=1)                                      # (B, 256)

    # fc1 / fc2 / fc3 (all padded to 128 lane-dense columns).
    a1 = jnp.maximum(dot(f, w1_ref[...]) + b1_ref[...], 0.0)         # (B, 128)
    a2 = jnp.maximum(dot(a1.astype(bf16), w2_ref[...]) + b2_ref[...], 0.0)
    o_ref[...] = (dot(a2.astype(bf16), w3_ref[...]) + b3_ref[...]).astype(o_ref.dtype)


# ----------------------------------------------------------------------------
# One-time weight preparation (outside the jitted hot path)
# ----------------------------------------------------------------------------
def prepare_weights(params, block_b=32):
    """Build banded Toeplitz conv matrices, the flatten gather and padded fc
    weights, all stored bf16 (biases f32)."""
    global _ROLL_IS_JNP_CONVENTION
    _ROLL_IS_JNP_CONVENTION = _detect_roll_convention()

    assert block_b % 8 == 0, "block_b must be a multiple of 8 (sublane tiling)"
    B = block_b
    f32 = np.float32

    conv1_w = np.asarray(params["conv1_w"], f32)     # (6, 1, 5, 5)
    conv1_b = np.asarray(params["conv1_b"], f32)
    conv2_w = np.asarray(params["conv2_w"], f32)     # (16, 6, 5, 5)
    conv2_b = np.asarray(params["conv2_b"], f32)

    # conv1 Toeplitz: K = dy*28 + xin, N = p*72 + xo*6 + co, output x = 2*xo + p.
    c1 = np.zeros((5, 28, 144), f32)
    for dy in range(5):
        for x in range(24):
            xo, p = x // 2, x % 2
            base = p * 72 + xo * 6
            for dx in range(5):
                c1[dy, x + dx, base:base + 6] = conv1_w[:, 0, dy, dx]
    c1 = c1.reshape(140, 144)
    b1c = np.tile(conv1_b, 24).reshape(1, 144)

    # conv2 Toeplitz over the compacted pool1 lanes (xo*6 + ci):
    # K = dy*72 + xin*6 + ci, N = p*64 + xo2*16 + co, output x2 = 2*xo2 + p.
    c2 = np.zeros((5, 72, 128), f32)
    for dy in range(5):
        for x2 in range(8):
            xo2, p = x2 // 2, x2 % 2
            base = p * 64 + xo2 * 16
            for dx in range(5):
                xin = x2 + dx
                for ci in range(6):
                    c2[dy, xin * 6 + ci, base:base + 16] = conv2_w[:, ci, dy, dx]
    c2 = c2.reshape(360, 128)
    b2c = np.tile(conv2_b, 8).reshape(1, 128)

    # Flatten row gather: picks row b*28 + 4*t (the t-th pooled output row).
    sf = np.zeros((4, B, B * 28), f32)
    for t in range(4):
        for b in range(B):
            sf[t, b, b * 28 + 4 * t] = 1.0

    # fc1 folded with the kernel's flatten order (t, xo, co); torch flatten of
    # the NCHW (16,4,4) map uses index co*16 + t*4 + xo.  Pad 120 -> 128 cols.
    fc1_w = np.asarray(params["fc1_w"], f32).reshape(120, 16, 4, 4)  # (j, co, yo, xo)
    w1s = np.zeros((256, 128), f32)
    w1s[:, :120] = np.transpose(fc1_w, (2, 3, 1, 0)).reshape(256, 120)
    b1f = np.zeros((1, 128), f32); b1f[0, :120] = np.asarray(params["fc1_b"], f32)

    w2s = np.zeros((128, 128), f32)
    w2s[:120, :84] = np.asarray(params["fc2_w"], f32).T
    b2f = np.zeros((1, 128), f32); b2f[0, :84] = np.asarray(params["fc2_b"], f32)

    w3s = np.zeros((128, 128), f32)
    w3s[:84, :10] = np.asarray(params["fc3_w"], f32).T
    b3f = np.zeros((1, 128), f32); b3f[0, :10] = np.asarray(params["fc3_b"], f32)

    bf = lambda a: jnp.asarray(a, dtype=jnp.bfloat16)
    ff = lambda a: jnp.asarray(a, dtype=jnp.float32)
    return (bf(c1), ff(b1c), bf(c2), ff(b2c), bf(sf),
            bf(w1s), ff(b1f), bf(w2s), ff(b2f), bf(w3s), ff(b3f))


def _vmem_limit_bytes():
    # Actual per-step usage is ~6-10 MB; keep >=25% headroom vs. chip capacity
    # (v7x has only 64 MiB / TC, v5e/v6e have 128 MiB).
    try:
        cap = int(pltpu.get_tpu_info().vmem_capacity_bytes)
    except Exception:
        cap = 64 * 1024 * 1024
    return min(int(cap * 0.75), 64 * 1024 * 1024)


# ----------------------------------------------------------------------------
# Forward (mirrors LeNet5.forward(x, _) of the PyTorch module)
# ----------------------------------------------------------------------------
def lenet5_forward(prepared, x, _unused=None):
    """x: (N, 1, 28, 28) float32 -> logits (N, 10)."""
    sf = prepared[4]
    B = sf.shape[1]                              # per-grid-step batch tile
    N = x.shape[0]
    n_pad = -(-N // B) * B
    if n_pad != N:
        x = jnp.concatenate(
            [x, jnp.zeros((n_pad - N,) + x.shape[1:], x.dtype)], axis=0)
    x2d = x.astype(jnp.float32).reshape(n_pad * 28, 28)   # rows = (n, y)

    in_specs = [pl.BlockSpec((B * 28, 28), lambda i: (i, 0))]
    in_specs += [pl.BlockSpec(w.shape, lambda i, nd=w.ndim: (0,) * nd)
                 for w in prepared]

    out = pl.pallas_call(
        _lenet5_kernel,
        grid=(n_pad // B,),
        in_specs=in_specs,
        out_specs=pl.BlockSpec((B, 128), lambda i: (i, 0)),
        out_shape=jax.ShapeDtypeStruct((n_pad, 128), jnp.float32),
        compiler_params=pltpu.CompilerParams(
            dimension_semantics=("parallel",),
            vmem_limit_bytes=_vmem_limit_bytes(),
        ),
    )(x2d, *prepared)
    return out[:N, :10]


# ----------------------------------------------------------------------------
# Pure-JAX reference (f32, HIGHEST precision) for the self check
# ----------------------------------------------------------------------------
def reference_forward(params, x):
    prec = jax.lax.Precision.HIGHEST
    dn = ("NCHW", "OIHW", "NCHW")
    out = jax.lax.conv_general_dilated(
        x, params["conv1_w"], (1, 1), "VALID",
        dimension_numbers=jax.lax.conv_dimension_numbers(
            x.shape, params["conv1_w"].shape, dn), precision=prec)
    out = jax.nn.relu(out + params["conv1_b"][None, :, None, None])
    out = out.reshape(out.shape[0], 6, 12, 2, 12, 2).max(axis=(3, 5))
    out = jax.lax.conv_general_dilated(
        out, params["conv2_w"], (1, 1), "VALID",
        dimension_numbers=jax.lax.conv_dimension_numbers(
            out.shape, params["conv2_w"].shape, dn), precision=prec)
    out = jax.nn.relu(out + params["conv2_b"][None, :, None, None])
    out = out.reshape(out.shape[0], 16, 4, 2, 4, 2).max(axis=(3, 5))
    out = out.reshape(out.shape[0], -1)
    out = jax.nn.relu(jnp.dot(out, params["fc1_w"].T, precision=prec) + params["fc1_b"])
    out = jax.nn.relu(jnp.dot(out, params["fc2_w"].T, precision=prec) + params["fc2_b"])
    return jnp.dot(out, params["fc3_w"].T, precision=prec) + params["fc3_b"]


# ----------------------------------------------------------------------------
# Deterministic parameter init (torch-style U(-1/sqrt(fan_in), 1/sqrt(fan_in)))
# ----------------------------------------------------------------------------
def init_params(key):
    def u(k, shape, fan_in):
        bound = 1.0 / float(fan_in) ** 0.5
        return jax.random.uniform(k, shape, jnp.float32, -bound, bound)

    ks = jax.random.split(key, 10)
    return {
        "conv1_w": u(ks[0], (6, 1, 5, 5), 1 * 5 * 5),
        "conv1_b": u(ks[1], (6,), 1 * 5 * 5),
        "conv2_w": u(ks[2], (16, 6, 5, 5), 6 * 5 * 5),
        "conv2_b": u(ks[3], (16,), 6 * 5 * 5),
        "fc1_w": u(ks[4], (120, 256), 256),
        "fc1_b": u(ks[5], (120,), 256),
        "fc2_w": u(ks[6], (84, 120), 120),
        "fc2_b": u(ks[7], (84,), 120),
        "fc3_w": u(ks[8], (10, 84), 84),
        "fc3_b": u(ks[9], (10,), 84),
    }


if __name__ == "__main__":
    key = jax.random.PRNGKey(0)
    pkey, xkey = jax.random.split(key)
    params = init_params(pkey)

    # LeNet5 with fc1=Linear(256,120) implies 28x28 single-channel input.
    # batch=64 with a 32-image tile -> grid of 2 (keeps both v7x TCs busy).
    batch = 64
    x = jax.random.normal(xkey, (batch, 1, 28, 28), jnp.float32)
    dummy = jnp.zeros((batch,), jnp.int32)      # second (ignored) forward arg

    prepared = prepare_weights(params, block_b=32)    # one-time weight prep
    fwd = jax.jit(lenet5_forward)

    logits = jax.block_until_ready(fwd(prepared, x, dummy))
    assert logits.shape == (batch, 10)
    assert bool(jnp.all(jnp.isfinite(logits)))

    # Numerical self-check against a HIGHEST-precision f32 JAX LeNet5.
    # The kernel deliberately uses bf16 matmul operands (f32 accumulation),
    # so allow a bf16-scale absolute tolerance on the (O(0.1)-magnitude) logits.
    ref = reference_forward(params, x)
    max_err = float(jnp.max(jnp.abs(logits - ref)))
    assert max_err < 5e-2, f"kernel/reference mismatch: {max_err}"

    print("KERNEL_OK")
</pallas_src>

<mosaic_0001>
module attributes {stable_mosaic.version = 11 : i64} {
  func.func @k(%arg0: memref<8x128xf32, #tpu.memory_space<vmem>>, %arg1: memref<8x128xf32, #tpu.memory_space<vmem>>) attributes {dimension_semantics = [], scalar_prefetch = 0 : i64, scratch_operands = 0 : i64, tpu.core_type = #tpu.core_type<tc>} {
    %c0 = arith.constant 0 : index
    %c0_0 = arith.constant 0 : index
    %0 = vector.load %arg0[%c0, %c0_0] : memref<8x128xf32, #tpu.memory_space<vmem>>, vector<8x128xf32>
    %c1_i32 = arith.constant 1 : i32
    %1 = tpu.dynamic_rotate %0 by %c1_i32 dim 0 : vector<8x128xf32>, i32 -> vector<8x128xf32>
    %c0_1 = arith.constant 0 : index
    %c0_2 = arith.constant 0 : index
    %2 = vector.load %arg1[%c0_1, %c0_2] : memref<8x128xf32, #tpu.memory_space<vmem>>, vector<8x128xf32>
    tpu.vector_store %arg1[%c0_1, %c0_2], %1 {strides = array<i32>} : memref<8x128xf32, #tpu.memory_space<vmem>>, vector<8x128xf32>,
    return
  }
}

</mosaic_0001>

<bundles_post_ra>
// kernel: tpu_custom_call.1
= control target key start
LH: loop header
LB: loop body
LE: loop exit
PB: predicated region body
PF: predicated region fallthrough
CT: control target
= control target key end

     0   :  { %6 = vsyncpa [#allocation3], 0  ;;  %s115_s0 = inlined_call_operand.hbm [shape: f32[8,128], index: 0, kind: input, shape index: {}]   ;;  %s116_s1 = inlined_call_operand.hbm [shape: f32[8,128], index: 1, kind: output, shape index: {}]  }
   0x1   :  { %7 = vsyncpa [#allocation4], 0  ;;  %s13_s8 = sshll.u32 %s115_s0, 4  ;;  %s97_s9 = smov [#allocation2]   ;;  %s14_s8 = int_to_ptr.hbm [resolvable:$true] %s13_s8 }
   0x2   :  { %s15_s10 = sshll.u32 %s97_s9, 4  ;;  %s16_s10 = int_to_ptr.vmem [resolvable:$true] %s15_s10 }
   0x3   :  { %18 = dma.hbm_to_vmem [thread:$0]  %s14_s8, 128, %s16_s10, [#allocation3]  }
   0x4   :  { %93 = dma.done.wait [#allocation3], 128  }
   0x5   :  { %94 = vsyncadd [#allocation3], 4294967168  ;;  %s98_s11 = smov [#allocation5]   ;;  %s33_s15 = sshll.u32 %s116_s1, 4  ;;  %v23_v0 = vld [vmem:[#allocation2] sm:$0xff]  ;;  %s34_s15 = int_to_ptr.hbm [resolvable:$true] %s33_s15 }
   0x6   :  { %s31_s12 = sshll.u32 %s98_s11, 4  ;;  %v24_v1 = vrot.slane %v23_v0, 7  ;;  %s32_s12 = int_to_ptr.vmem [resolvable:$true] %s31_s12 }
   0x8   :  { %25 = vst [vmem:[#allocation5] sm:$0xff] %v24_v1 }
   0x9   :  { %36 = dma.vmem_to_hbm [thread:$0]  %s32_s12, 128, %s34_s15, [#allocation4]  }
   0xa   :  { %95 = dma.done.wait [#allocation4], 128  }
   0xb   :  { %96 = vsyncadd [#allocation4], 4294967168 }
   0xc   :  { %41 = vsyncpa [#allocation3], 1 }
   0xd   :  { %42 = vsyncpa [#allocation4], 1 }

</bundles_post_ra>
